<compile_context>
chip_gen: v6e
topology: v6e:2x2x1
jax: 0.10.0
libtpu: 0.0.40
codegen_flags: <defaults>
</compile_context>

<pallas_src>
import functools

import jax
import jax.numpy as jnp
from jax.experimental import pallas as pl
from jax.experimental.pallas import tpu as pltpu


def _loss_kernel(x_ref, w1_ref, b1_ref, w2_ref, b2_ref, out_ref, *, inv_b):
    """Accumulate sum_i relu(x_i @ W1 + b1) . w2 over batch tiles; finalize loss.

    x:   [TB, D]  bf16 (batch tile, streamed)
    w1:  [D, H]   bf16 (pinned)
    b1:  [1, H]   f32  (pinned)
    w2:  [1, H]   f32  (pinned, row layout)
    b2:  (1,)     f32  scalar in SMEM
    out: [1, 1]   f32  accumulator; same block every step -> stays VMEM-resident
    """
    step = pl.program_id(0)

    @pl.when(step == 0)
    def _init():
        out_ref[...] = jnp.zeros_like(out_ref)

    # Layer 1 on the MXU: bf16 operands, f32 accumulation.
    h = jnp.dot(x_ref[...], w1_ref[...], preferred_element_type=jnp.float32)
    h = jnp.maximum(h + b1_ref[...], 0.0)                            # f32 VPU epilogue

    # sum_i (h_i . w2): reduce the batch first (one sublane reduce -> [1, H]),
    # then a VPU multiply + a single cross-lane reduce (no tiny MXU dot).
    h_sum = jnp.sum(h, axis=0, keepdims=True)                        # [1, H]
    tile_sum = jnp.sum(h_sum * w2_ref[...], axis=1, keepdims=True)   # [1, 1]
    out_ref[...] += tile_sum

    @pl.when(step == pl.num_programs(0) - 1)
    def _finalize():
        # mean(-(h @ w2 + b2)) = -(sum_i h_i . w2) / B - b2   (b2 applied once).
        out_ref[...] = -(out_ref[...] * inv_b) - b2_ref[0]


def human_music_val_loss(x, w1, b1, w2, b2, *, tb=None):
    """loss = mean(-model(x)); model = ReLU-MLP scorer, fused into one kernel.

    x: [B, D] features, w1: [D, H], b1: [1, H], w2: [H, 1], b2: [1, 1].
    tb: optional batch tile (divisor of B); default is a single grid step.
    """
    B, D = x.shape
    H = w1.shape[1]

    # Single grid step by default: on the 1-TC chips (v5e/v6e) a multi-step
    # grid only adds ~0.35 us/step plus a separate XLA dispatch for a partial
    # sum -- comparable to the whole kernel at this size.  Pass tb only when B
    # grows large enough that x-tile streaming / megacore sharding pays off.
    if tb is None or tb <= 0 or B % tb != 0:
        tb = B
    num_tiles = B // tb

    # bf16 operands for the MXU / halved x+W1 DMA bytes; f32 accumulation.
    x_bf = x.astype(jnp.bfloat16)
    w1_bf = w1.astype(jnp.bfloat16)
    b1_f = jnp.asarray(b1, jnp.float32).reshape(1, H)
    w2_row = jnp.asarray(w2, jnp.float32).reshape(1, H)   # row layout for the VPU
    b2_s = jnp.asarray(b2, jnp.float32).reshape(1)        # 1-D SMEM scalar

    cost = pl.CostEstimate(
        flops=2 * B * D * H + 4 * B * H,
        transcendentals=0,
        bytes_accessed=(x_bf.size * 2 + w1_bf.size * 2 + b1_f.size * 4
                        + w2_row.size * 4 + b2_s.size * 4 + 4),
    )

    # TODO(synk): for a real pretrained scorer (D, H in the thousands) re-tile
    # with H as a streamed grid axis: keep the x tile resident, double-buffer
    # W1 column tiles (D, TH) with D/TH multiples of 256 for v6e/v7x's 256-wide
    # MXUs, accumulate sum_rows(relu(x @ W1[:, th] + b1[th])) . w2[th] into the
    # same scalar accumulator (exact -- ReLU is elementwise, no [TB, H] f32
    # buffer needed), keep 2*(D*TH*2B) of W1 buffers <= ~32 MiB for v7x's
    # 64 MiB VMEM, mark pinned operands pipeline_mode=pl.Buffered(1), and set
    # vmem_limit_bytes explicitly.  At the sizes here (W1 = 32 KiB) everything
    # fits the default scoped-VMEM limits comfortably.
    out = pl.pallas_call(
        functools.partial(_loss_kernel, inv_b=1.0 / B),
        out_shape=jax.ShapeDtypeStruct((1, 1), jnp.float32),
        grid=(num_tiles,),
        in_specs=[
            pl.BlockSpec((tb, D), lambda i: (i, 0)),            # x tile (streamed)
            pl.BlockSpec((D, H), lambda i: (0, 0)),             # W1 pinned
            pl.BlockSpec((1, H), lambda i: (0, 0)),             # b1 pinned
            pl.BlockSpec((1, H), lambda i: (0, 0)),             # w2 row pinned
            pl.BlockSpec(memory_space=pltpu.MemorySpace.SMEM),  # b2 scalar
        ],
        out_specs=pl.BlockSpec((1, 1), lambda i: (0, 0)),       # loss accumulator
        compiler_params=pltpu.CompilerParams(
            dimension_semantics=("arbitrary",)),                # reduction axis
        cost_estimate=cost,
    )(x_bf, w1_bf, b1_f, w2_row, b2_s)

    return out[0, 0]


def _reference(x, w1, b1, w2, b2):
    h = jnp.maximum(x @ w1 + b1, 0.0)
    scores = h @ w2 + b2               # [B, 1]
    return jnp.mean(-scores)


if __name__ == "__main__":
    # Batch of pre-extracted feature vectors (musics2input output).
    B, D, H = 256, 128, 128

    key = jax.random.PRNGKey(0)
    kx, k1, k2, k3, k4 = jax.random.split(key, 5)

    x = jax.random.normal(kx, (B, D), dtype=jnp.float32)
    # Deterministic synthetic "pretrained scorer" parameters.
    w1 = jax.random.normal(k1, (D, H), dtype=jnp.float32) * 0.05
    b1 = jax.random.normal(k2, (1, H), dtype=jnp.float32) * 0.05
    w2 = jax.random.normal(k3, (H, 1), dtype=jnp.float32) * 0.05
    b2 = jax.random.normal(k4, (1, 1), dtype=jnp.float32) * 0.05

    loss = jax.block_until_ready(human_music_val_loss(x, w1, b1, w2, b2))

    # Tight check against a reference that mirrors the kernel's bf16 operand
    # rounding (f32 accumulation in both).
    ref_bf = _reference(x.astype(jnp.bfloat16).astype(jnp.float32),
                        w1.astype(jnp.bfloat16).astype(jnp.float32),
                        b1, w2, b2)
    assert jnp.allclose(loss, ref_bf, atol=1e-4, rtol=1e-4), (loss, ref_bf)

    # Looser check against the full-f32 semantics of the original module.
    ref_f32 = _reference(x, w1, b1, w2, b2)
    assert jnp.allclose(loss, ref_f32, atol=1e-2, rtol=1e-2), (loss, ref_f32)

    # Also exercise the tiled/accumulator path once (2 batch tiles).
    loss_tiled = jax.block_until_ready(
        human_music_val_loss(x, w1, b1, w2, b2, tb=128))
    assert jnp.allclose(loss_tiled, ref_bf, atol=1e-4, rtol=1e-4), (loss_tiled, ref_bf)

    # TODO(synk): `musics2input` preprocessing (CPU numpy feature extraction)
    # and checkpoint loading (`load_model`) have no Pallas equivalent; the
    # kernel consumes already-extracted features and in-script scorer weights.
    print("KERNEL_OK")
</pallas_src>

<mosaic_0001>
module attributes {stable_mosaic.version = 11 : i64} {
  func.func @_loss_kernel(%arg0: i32, %arg1: memref<256x128xbf16, #tpu.memory_space<vmem>>, %arg2: memref<128x128xbf16, #tpu.memory_space<vmem>>, %arg3: memref<1x128xf32, #tpu.memory_space<vmem>>, %arg4: memref<1x128xf32, #tpu.memory_space<vmem>>, %arg5: memref<1xf32, #tpu.memory_space<smem>>, %arg6: memref<1x1xf32, #tpu.memory_space<vmem>>) attributes {dimension_semantics = [#tpu.dimension_semantics<arbitrary>], iteration_bounds = array<i64: 1>, scalar_prefetch = 0 : i64, scratch_operands = 0 : i64, tpu.core_type = #tpu.core_type<tc>, window_params = [{transform_indices = @transform_0, window_bounds = array<i64: 256, 128>}, {pipeline_mode = #tpu.pipeline_mode<synchronous>, transform_indices = @transform_1, window_bounds = array<i64: 128, 128>}, {pipeline_mode = #tpu.pipeline_mode<synchronous>, transform_indices = @transform_2, window_bounds = array<i64: 1, 128>}, {pipeline_mode = #tpu.pipeline_mode<synchronous>, transform_indices = @transform_3, window_bounds = array<i64: 1, 128>}, {transform_indices = @transform_4, window_bounds = array<i64: 1>}, {pipeline_mode = #tpu.pipeline_mode<synchronous>, transform_indices = @transform_5, window_bounds = array<i64: 1, 1>}]} {
    %c0_i32 = arith.constant 0 : i32
    %0 = arith.cmpi eq, %arg0, %c0_i32 : i32
    %1 = arith.extui %0 : i1 to i32
    %c0_i32_0 = arith.constant 0 : i32
    %2 = arith.cmpi ne, %1, %c0_i32_0 : i32
    scf.if %2 {
      %cst_17 = arith.constant 0.000000e+00 : f32
      %23 = vector.broadcast %cst_17 : f32 to vector<1x1xf32>
      %c0_18 = arith.constant 0 : index
      %c0_19 = arith.constant 0 : index
      %24 = vector.load %arg6[%c0_18, %c0_19] : memref<1x1xf32, #tpu.memory_space<vmem>>, vector<1x1xf32>
      tpu.vector_store %arg6[%c0_18, %c0_19], %23 {strides = array<i32>} : memref<1x1xf32, #tpu.memory_space<vmem>>, vector<1x1xf32>,
    } else {
    }
    %c0 = arith.constant 0 : index
    %c0_1 = arith.constant 0 : index
    %3 = vector.load %arg1[%c0, %c0_1] : memref<256x128xbf16, #tpu.memory_space<vmem>>, vector<256x128xbf16>
    %c0_2 = arith.constant 0 : index
    %c0_3 = arith.constant 0 : index
    %4 = vector.load %arg2[%c0_2, %c0_3] : memref<128x128xbf16, #tpu.memory_space<vmem>>, vector<128x128xbf16>
    %cst = arith.constant dense<0.000000e+00> : vector<256x128xf32>
    %5 = tpu.matmul %3, %4, %cst {dimension_numbers = #tpu.dot_dimension_numbers<[1], [0], [0], [1], [0, 0, 1, 1], [], []>} : vector<256x128xbf16>, vector<128x128xbf16>, vector<256x128xf32> -> vector<256x128xf32>
    %c0_4 = arith.constant 0 : index
    %c0_5 = arith.constant 0 : index
    %6 = vector.load %arg3[%c0_4, %c0_5] : memref<1x128xf32, #tpu.memory_space<vmem>>, vector<1x128xf32>
    %7 = vector.broadcast %6 : vector<1x128xf32> to vector<256x128xf32>
    %8 = arith.addf %5, %7 : vector<256x128xf32>
    %cst_6 = arith.constant 0.000000e+00 : f32
    %9 = vector.broadcast %cst_6 : f32 to vector<256x128xf32>
    %10 = arith.maximumf %8, %9 : vector<256x128xf32>
    %cst_7 = arith.constant dense<0.000000e+00> : vector<128xf32>
    %11 = vector.multi_reduction <add>, %10, %cst_7 [0] : vector<256x128xf32> to vector<128xf32>
    %12 = vector.shape_cast %11 : vector<128xf32> to vector<1x128xf32>
    %c0_8 = arith.constant 0 : index
    %c0_9 = arith.constant 0 : index
    %13 = vector.load %arg4[%c0_8, %c0_9] : memref<1x128xf32, #tpu.memory_space<vmem>>, vector<1x128xf32>
    %14 = arith.mulf %12, %13 : vector<1x128xf32>
    %cst_10 = arith.constant dense<0.000000e+00> : vector<1xf32>
    %15 = vector.multi_reduction <add>, %14, %cst_10 [1] : vector<1x128xf32> to vector<1xf32>
    %16 = vector.shape_cast %15 : vector<1xf32> to vector<1x1xf32>
    %c0_11 = arith.constant 0 : index
    %c0_12 = arith.constant 0 : index
    %17 = vector.load %arg6[%c0_11, %c0_12] : memref<1x1xf32, #tpu.memory_space<vmem>>, vector<1x1xf32>
    %18 = arith.addf %17, %16 : vector<1x1xf32>
    %c0_13 = arith.constant 0 : index
    %c0_14 = arith.constant 0 : index
    %19 = vector.load %arg6[%c0_13, %c0_14] : memref<1x1xf32, #tpu.memory_space<vmem>>, vector<1x1xf32>
    tpu.vector_store %arg6[%c0_13, %c0_14], %18 {strides = array<i32>} : memref<1x1xf32, #tpu.memory_space<vmem>>, vector<1x1xf32>,
    %c0_i32_15 = arith.constant 0 : i32
    %20 = arith.cmpi eq, %arg0, %c0_i32_15 : i32
    %21 = arith.extui %20 : i1 to i32
    %c0_i32_16 = arith.constant 0 : i32
    %22 = arith.cmpi ne, %21, %c0_i32_16 : i32
    scf.if %22 {
      %c0_17 = arith.constant 0 : index
      %c0_18 = arith.constant 0 : index
      %23 = vector.load %arg6[%c0_17, %c0_18] : memref<1x1xf32, #tpu.memory_space<vmem>>, vector<1x1xf32>
      %cst_19 = arith.constant 3.906250e-03 : f32
      %24 = vector.broadcast %cst_19 : f32 to vector<1x1xf32>
      %25 = arith.mulf %23, %24 : vector<1x1xf32>
      %cst_20 = arith.constant 0.000000e+00 : f32
      %26 = vector.broadcast %cst_20 : f32 to vector<1x1xf32>
      %27 = arith.subf %26, %25 : vector<1x1xf32>
      %c0_21 = arith.constant 0 : index
      %28 = memref.load %arg5[%c0_21] : memref<1xf32, #tpu.memory_space<smem>>
      %29 = vector.broadcast %28 : f32 to vector<1x1xf32>
      %30 = arith.subf %27, %29 : vector<1x1xf32>
      %c0_22 = arith.constant 0 : index
      %c0_23 = arith.constant 0 : index
      %31 = vector.load %arg6[%c0_22, %c0_23] : memref<1x1xf32, #tpu.memory_space<vmem>>, vector<1x1xf32>
      tpu.vector_store %arg6[%c0_22, %c0_23], %30 {strides = array<i32>} : memref<1x1xf32, #tpu.memory_space<vmem>>, vector<1x1xf32>,
    } else {
    }
    return
  }
  func.func @transform_0(%arg0: i32) -> (i32, i32) {
    %c0_i32 = arith.constant 0 : i32
    %c0_i32_0 = arith.constant 0 : i32
    return %arg0, %c0_i32 : i32, i32
  }
  func.func @transform_1(%arg0: i32) -> (i32, i32) {
    %c0_i32 = arith.constant 0 : i32
    %c0_i32_0 = arith.constant 0 : i32
    %c0_i32_1 = arith.constant 0 : i32
    return %c0_i32, %c0_i32_0 : i32, i32
  }
  func.func @transform_2(%arg0: i32) -> (i32, i32) {
    %c0_i32 = arith.constant 0 : i32
    %c0_i32_0 = arith.constant 0 : i32
    %c0_i32_1 = arith.constant 0 : i32
    return %c0_i32, %c0_i32_0 : i32, i32
  }
  func.func @transform_3(%arg0: i32) -> (i32, i32) {
    %c0_i32 = arith.constant 0 : i32
    %c0_i32_0 = arith.constant 0 : i32
    %c0_i32_1 = arith.constant 0 : i32
    return %c0_i32, %c0_i32_0 : i32, i32
  }
  func.func @transform_4(%arg0: i32) -> i32 {
    %c0_i32 = arith.constant 0 : i32
    %c0_i32_0 = arith.constant 0 : i32
    return %c0_i32 : i32
  }
  func.func @transform_5(%arg0: i32) -> (i32, i32) {
    %c0_i32 = arith.constant 0 : i32
    %c0_i32_0 = arith.constant 0 : i32
    %c0_i32_1 = arith.constant 0 : i32
    return %c0_i32, %c0_i32_0 : i32, i32
  }
}

</mosaic_0001>

<bundles_post_ra>
// kernel: tpu_custom_call.1
= control target key start
LH: loop header
LB: loop body
LE: loop exit
PB: predicated region body
PF: predicated region fallthrough
CT: control target
= control target key end

     0   :  { %11 = vsyncpa [#allocation4], 0  ;;  %s834_s0 = inlined_call_operand.hbm [shape: bf16[256,128], index: 0, kind: input, shape index: {}]   ;;  %s835_s1 = inlined_call_operand.hbm [shape: bf16[128,128], index: 1, kind: input, shape index: {}]   ;;  %s836_s2 = inlined_call_operand.vmem [shape: f32[1,128], index: 2, kind: input, shape index: {}]   ;;  %s837_s3 = inlined_call_operand.vmem [shape: f32[1,128], index: 3, kind: input, shape index: {}]   ;;  %s838_s4 = inlined_call_operand.<no memory space> [shape: f32[1], index: 4, kind: input, shape index: {}]   ;;  %s839_s5 = inlined_call_operand.hbm [shape: f32[1,1], index: 5, kind: output, shape index: {}]  }
   0x1   :  { %12 = vsyncpa [#allocation7], 0 }
   0x2   :  { %13 = vsyncpa [#allocation5], 0  ;;  %s731_s18 = smov [#allocation3]  }
   0x3   :  { %s19_s19 = sshll.u32 %s731_s18, 4  ;;  %s20_s19 = int_to_ptr.vmem [resolvable:$true] %s19_s19 }
   0x4   :  { %s673_s20 = scalar_lea.vmem %s20_s19, 2048  ;;  %p678_p1 = scmp.lt.s32.totalorder %s20_s19, %s20_s19 }
   0x5   :  { %p674_p0 = scmp.ne.s32.totalorder %s20_s19, %s673_s20  ;;  %p679_p2 = scmp.lt.s32.totalorder %s673_s20, %s673_s20 }
   0x7   :  { %p680_p3 = por %p679_p2, %p678_p1 }
   0x9   :  { %p681_p4 = pnand %p680_p3, %p674_p0 }
   0xb   :  { %684 = shalt.err (!%p681_p4)
}
   0xc   :  { %s732_s21 = smov 64   ;;  %s733_s22 = smov 4  }
   0xd   :  { %25 = dma.hbm_to_vmem [thread:$0]  %s834_s0, 2048, %s20_s19, [#allocation4], %s732_s21, %s732_s21, %s733_s22  }
   0xe   :  { %s734_s25 = smov [#allocation6]  }
   0xf   :  { %s31_s26 = sshll.u32 %s734_s25, 4  ;;  %s32_s26 = int_to_ptr.vmem [resolvable:$true] %s31_s26 }
  0x10   :  { %s693_s27 = scalar_lea.vmem %s32_s26, 1024  ;;  %p698_p6 = scmp.lt.s32.totalorder %s32_s26, %s32_s26 }
  0x11   :  { %p694_p5 = scmp.ne.s32.totalorder %s32_s26, %s693_s27  ;;  %p699_p7 = scmp.lt.s32.totalorder %s693_s27, %s693_s27 }
  0x13   :  { %p700_p8 = por %p699_p7, %p698_p6 }
  0x15   :  { %p701_p9 = pnand %p700_p8, %p694_p5 }
  0x17   :  { %704 = shalt.err (!%p701_p9)
}
  0x18   :  { %37 = dma.hbm_to_vmem [thread:$0]  %s835_s1, 1024, %s32_s26, [#allocation7], %s732_s21, %s732_s21, %s733_s22  }
  0x19   :  { %725 = dma.done.wait [#allocation4], 2048  }
  0x1a   :  { %726 = vsyncadd [#allocation4], 4294965248 }
  0x1b   :  { %727 = dma.done.wait [#allocation7], 1024  }
  0x1c   :  { %728 = vsyncadd [#allocation7], 4294966272  ;;  %v641_v0 = vld [vmem:[#allocation6 + $0x38] sm:$0xff]   ;;  %v642_v1 = vld [vmem:[#allocation6 + $0x30] sm:$0xff]   ;;  %vm55_vm0 = vcmask 0   ;;  %v735_v24 = vmov 0.0  }
  0x1d   :  { %571 = vmatprep.subr.bf16.mxu0 %v641_v0  ;;  %619 = vmatprep.subr.bf16.mxu1 %v641_v0  ;;  %v643_v2 = vld [vmem:[#allocation6 + $0x28] sm:$0xff]   ;;  %v644_v3 = vld [vmem:[#allocation6 + $0x20] sm:$0xff]   ;;  %v645_v5 = vld [vmem:[#allocation6 + $0x18] sm:$0xff]   ;;  %56 = vst.msk [vmem:[#allocation8] sm:$0x1] %vm55_vm0, %v735_v24  ;;  %vm488_vm1 = vcmask 1040384  }
  0x1e   :  { %572 = vmatpush3.bf16.msra.mxu0 %v641_v0  ;;  %627 = vmatpush3.bf16.msra.mxu1 %v641_v0  ;;  %v649_v4 = vld [vmem:[#allocation3] sm:$0xff]   ;;  %v646_v6 = vld [vmem:[#allocation6 + $0x10] sm:$0xff]   ;;  %v647_v8 = vld [vmem:[#allocation6 + $0x8] sm:$0xff]   ;;  %s736_s8 = smov [#allocation8]  }
  0x1f   :  { %573 = vmatprep.subr.bf16.mxu0 %v642_v1  ;;  %620 = vmatprep.subr.bf16.mxu1 %v642_v1  ;;  %v657_v7 = vld [vmem:[#allocation3 + $0x40] sm:$0xff]   ;;  %v650_v10 = vld [vmem:[#allocation3 + $0x8] sm:$0xff]   ;;  %v651_v12 = vld [vmem:[#allocation3 + $0x10] sm:$0xff]   ;;  %s512_s9 = sshll.u32 %s736_s8, 4  ;;  %s513_s9 = int_to_ptr.vmem [resolvable:$true] %s512_s9 }
  0x20   :  { %587 = vmatprep.mubr.bf16.mxu0 %v649_v4  ;;  %603 = vmatprep.mubr.bf16.mxu1 %v657_v7  ;;  %v648_v9 = vld [vmem:[#allocation6] sm:$0xff]   ;;  %v658_v11 = vld [vmem:[#allocation3 + $0x48] sm:$0xff]   ;;  %v659_v13 = vld [vmem:[#allocation3 + $0x50] sm:$0xff]   ;;  %s709_s10 = scalar_lea.vmem %s513_s9, 32  ;;  %p710_p11 = scmp.lt.s32.totalorder %s513_s9, %s513_s9 }
  0x21   :  { %v652_v14 = vld [vmem:[#allocation3 + $0x18] sm:$0xff]   ;;  %v653_v16 = vld [vmem:[#allocation3 + $0x20] sm:$0xff]   ;;  %v654_v18 = vld [vmem:[#allocation3 + $0x28] sm:$0xff]  }
  0x22   :  { %574 = vmatpush3.bf16.msra.mxu0 %v642_v1  ;;  %628 = vmatpush3.bf16.msra.mxu1 %v642_v1  ;;  %v660_v15 = vld [vmem:[#allocation3 + $0x58] sm:$0xff]   ;;  %v661_v17 = vld [vmem:[#allocation3 + $0x60] sm:$0xff]   ;;  %v662_v19 = vld [vmem:[#allocation3 + $0x68] sm:$0xff]  }
  0x23   :  { %575 = vmatprep.subr.bf16.mxu0 %v643_v2  ;;  %621 = vmatprep.subr.bf16.mxu1 %v643_v2  ;;  %v655_v20 = vld [vmem:[#allocation3 + $0x30] sm:$0xff]   ;;  %v656_v22 = vld [vmem:[#allocation3 + $0x38] sm:$0xff]   ;;  %v781_v29 = vld [vmem:[%s836_s2] ss:$0 sm:$0xff] }
  0x24   :  { %v663_v21 = vld [vmem:[#allocation3 + $0x70] sm:$0xff]   ;;  %v664_v23 = vld [vmem:[#allocation3 + $0x78] sm:$0xff]  }
  0x26   :  { %576 = vmatpush3.bf16.msra.mxu0 %v643_v2  ;;  %629 = vmatpush3.bf16.msra.mxu1 %v643_v2 }
  0x27   :  { %577 = vmatprep.subr.bf16.mxu0 %v644_v3  ;;  %622 = vmatprep.subr.bf16.mxu1 %v644_v3 }
  0x2a   :  { %578 = vmatpush3.bf16.msra.mxu0 %v644_v3  ;;  %630 = vmatpush3.bf16.msra.mxu1 %v644_v3 }
  0x2b   :  { %579 = vmatprep.subr.bf16.mxu0 %v645_v5  ;;  %623 = vmatprep.subr.bf16.mxu1 %v645_v5 }
  0x2e   :  { %580 = vmatpush3.bf16.msra.mxu0 %v645_v5  ;;  %631 = vmatpush3.bf16.msra.mxu1 %v645_v5 }
  0x2f   :  { %581 = vmatprep.subr.bf16.mxu0 %v646_v6  ;;  %624 = vmatprep.subr.bf16.mxu1 %v646_v6 }
  0x32   :  { %582 = vmatpush3.bf16.msra.mxu0 %v646_v6  ;;  %632 = vmatpush3.bf16.msra.mxu1 %v646_v6 }
  0x33   :  { %583 = vmatprep.subr.bf16.mxu0 %v647_v8  ;;  %625 = vmatprep.subr.bf16.mxu1 %v647_v8 }
  0x36   :  { %584 = vmatpush3.bf16.msra.mxu0 %v647_v8  ;;  %633 = vmatpush3.bf16.msra.mxu1 %v647_v8 }
  0x37   :  { %585 = vmatprep.subr.bf16.mxu0 %v648_v9  ;;  %626 = vmatprep.subr.bf16.mxu1 %v648_v9 }
  0x3a   :  { %586 = vmatpush3.bf16.msra.mxu0 %v648_v9  ;;  %634 = vmatpush3.bf16.msra.mxu1 %v648_v9 }
  0x3d   :  { %588 = vmatmul.mubr.bf16.vlgmr.msra.gmra.mxu0 %v650_v10  ;;  %604 = vmatmul.mubr.bf16.vlgmr.msra.gmra.mxu1 %v658_v11 }
  0x3e   :  { %591 = vmatprep.mubr.bf16.mxu0 %v651_v12  ;;  %607 = vmatprep.mubr.bf16.mxu1 %v659_v13 }
  0x45   :  { %592 = vmatmul.mubr.bf16.gmra.mxu0 %v652_v14  ;;  %608 = vmatmul.mubr.bf16.gmra.mxu1 %v660_v15 }
  0x46   :  { %595 = vmatprep.mubr.bf16.mxu0 %v653_v16  ;;  %611 = vmatprep.mubr.bf16.mxu1 %v661_v17 }
  0x4d   :  { %596 = vmatmul.mubr.bf16.gmra.mxu0 %v654_v18  ;;  %612 = vmatmul.mubr.bf16.gmra.mxu1 %v662_v19 }
  0x4e   :  { %599 = vmatprep.mubr.bf16.mxu0 %v655_v20  ;;  %615 = vmatprep.mubr.bf16.mxu1 %v663_v21 }
  0x55   :  { %600 = vmatmul.mubr.bf16.gmra.mxu0 %v656_v22  ;;  %616 = vmatmul.mubr.bf16.gmra.mxu1 %v664_v23 }
  0xfd   :  { %v589_v25 = vpop.f32.mrf.mxu0  ;;  %v774_v26 = vpop.f32.mrf.mxu1 }
  0xfe   :  { %v299_v34 = vadd.f32 %v589_v25, %v781_v29 }
  0xff   :  { %v290_v27 = vpop.f32.mrf.mxu0  ;;  %v776_v28 = vpop.f32.mrf.mxu1 }
 0x100   :  { %v291_v31 = vadd.f32 %v781_v29, %v290_v27  ;;  %v419_v42 = vmax.f32 %v299_v34, 0.0 }
 0x101   :  { %v590_v30 = vpop.f32.mrf.mxu0  ;;  %v784_v33 = vpop.f32.mrf.mxu1 }
 0x102   :  { %v417_v37 = vmax.f32 %v291_v31, 0.0  ;;  %v302_v38 = vadd.f32 %v590_v30, %v781_v29 }
 0x103   :  { %v293_v32 = vpop.f32.mrf.mxu0  ;;  %v357_v41 = vpop.f32.mrf.mxu1 }
 0x104   :  { %v294_v35 = vadd.f32 %v781_v29, %v293_v32  ;;  %v420_v46 = vmax.f32 %v302_v38, 0.0 }
 0x105   :  { %v593_v36 = vpop.f32.mrf.mxu0  ;;  %v790_v49 = vpop.f32.mrf.mxu1 }
 0x106   :  { %v418_v39 = vmax.f32 %v294_v35, 0.0  ;;  %v315_v50 = vadd.f32 %v593_v36, %v781_v29  ;;  %v355_v35 = vadd.f32 %v781_v29, %v776_v28 }
 0x107   :  { %v306_v40 = vpop.f32.mrf.mxu0  ;;  %v370_v59 = vpop.f32.mrf.mxu1 }
 0x108   :  { %v449_v43 = vadd.f32 %v418_v39, %v417_v37  ;;  %v307_v44 = vadd.f32 %v781_v29, %v306_v40  ;;  %v423_v60 = vmax.f32 %v315_v50, 0.0  ;;  %v358_v39 = vadd.f32 %v781_v29, %v357_v41 }
 0x109   :  { %v594_v45 = vpop.f32.mrf.mxu0  ;;  %v610_v3 = vpop.f32.mrf.mxu1  ;;  %v371_v28 = vadd.f32 %v781_v29, %v370_v59 }
 0x10a   :  { %v450_v47 = vadd.f32 %v449_v43, %v419_v42  ;;  %v421_v51 = vmax.f32 %v307_v44, 0.0  ;;  %v318_v56 = vadd.f32 %v594_v45, %v781_v29  ;;  %v363_v42 = vadd.f32 %v774_v26, %v781_v29 }
 0x10b   :  { %v309_v48 = vpop.f32.mrf.mxu0  ;;  %v373_v13 = vpop.f32.mrf.mxu1  ;;  %v433_v43 = vmax.f32 %v355_v35, 0.0  ;;  %v366_v45 = vadd.f32 %v784_v33, %v781_v29  ;;  %v379_v26 = vadd.f32 %v790_v49, %v781_v29  ;;  %v382_v33 = vadd.f32 %v610_v3, %v781_v29  ;;  %v486_v35 = vld [vmem:[%s837_s3] sm:$0x1]  ;;  %s705_s3 = scalar_lea.vmem %s513_s9, 16 }
 0x10c   :  { %v451_v52 = vadd.f32 %v450_v47, %v420_v46  ;;  %v310_v53 = vadd.f32 %v781_v29, %v309_v48  ;;  %v424_v0 = vmax.f32 %v318_v56, 0.0  ;;  %v434_v46 = vmax.f32 %v358_v39, 0.0  ;;  %p706_p10 = scmp.ne.s32.totalorder %s513_s9, %s705_s3  ;;  %p711_p12 = scmp.lt.s32.totalorder %s709_s10, %s705_s3 }
 0x10d   :  { %v597_v54 = vpop.f32.mrf.mxu0  ;;  %v613_v21 = vpop.f32.mrf.mxu1  ;;  %v435_v50 = vmax.f32 %v363_v42, 0.0  ;;  %v374_v41 = vadd.f32 %v781_v29, %v373_v13  ;;  %v440_v59 = vmax.f32 %v382_v33, 0.0 }
 0x10e   :  { %v452_v55 = vadd.f32 %v451_v52, %v421_v51  ;;  %v422_v57 = vmax.f32 %v310_v53, 0.0  ;;  %v331_v4 = vadd.f32 %v597_v54, %v781_v29  ;;  %v436_v52 = vmax.f32 %v366_v45, 0.0  ;;  %p712_p13 = por %p711_p12, %p710_p11 }
 0x10f   :  { %v322_v58 = vpop.f32.mrf.mxu0  ;;  %v386_v32 = vpop.f32.mrf.mxu1 }
 0x110   :  { %v453_v61 = vadd.f32 %v452_v55, %v422_v57  ;;  %v323_v62 = vadd.f32 %v781_v29, %v322_v58  ;;  %v427_v14 = vmax.f32 %v331_v4, 0.0  ;;  %v437_v55 = vmax.f32 %v371_v28, 0.0  ;;  %p713_p0 = pnand %p712_p13, %p706_p10 }
 0x111   :  { %v598_v63 = vpop.f32.mrf.mxu0  ;;  %v614_v40 = vpop.f32.mrf.mxu1  ;;  %v438_v58 = vmax.f32 %v374_v41, 0.0  ;;  %v395_v4 = vadd.f32 %v613_v21, %v781_v29 }
 0x112   :  { %v454_v1 = vadd.f32 %v453_v61, %v423_v60  ;;  %v425_v5 = vmax.f32 %v323_v62, 0.0  ;;  %v334_v10 = vadd.f32 %v598_v63, %v781_v29  ;;  %v439_v61 = vmax.f32 %v379_v26, 0.0 }
 0x113   :  { %v325_v2 = vpop.f32.mrf.mxu0  ;;  %v389_v48 = vpop.f32.mrf.mxu1  ;;  %v387_v63 = vadd.f32 %v781_v29, %v386_v32 }
 0x114   :  { %v455_v6 = vadd.f32 %v454_v1, %v424_v0  ;;  %v326_v7 = vadd.f32 %v781_v29, %v325_v2  ;;  %v428_v18 = vmax.f32 %v334_v10, 0.0  ;;  %v390_v1 = vadd.f32 %v781_v29, %v389_v48 }
 0x115   :  { %v601_v8 = vpop.f32.mrf.mxu0  ;;  %v617_v54 = vpop.f32.mrf.mxu1 }
 0x116   :  { %v456_v9 = vadd.f32 %v455_v6, %v425_v5  ;;  %v426_v11 = vmax.f32 %v326_v7, 0.0  ;;  %v347_v22 = vadd.f32 %v601_v8, %v781_v29  ;;  %v441_v5 = vmax.f32 %v387_v63, 0.0 }
 0x117   :  { %v338_v12 = vpop.f32.mrf.mxu0  ;;  %v402_v60 = vpop.f32.mrf.mxu1  ;;  %v398_v7 = vadd.f32 %v614_v40, %v781_v29  ;;  %v442_v8 = vmax.f32 %v390_v1, 0.0 }
 0x118   :  { %v457_v15 = vadd.f32 %v456_v9, %v426_v11  ;;  %v339_v16 = vadd.f32 %v781_v29, %v338_v12  ;;  %v431_v34 = vmax.f32 %v347_v22, 0.0  ;;  %v443_v9 = vmax.f32 %v395_v4, 0.0 }
 0x119   :  { %v602_v17 = vpop.f32.mrf.mxu0  ;;  %v618_v2 = vpop.f32.mrf.mxu1  ;;  %v403_v11 = vadd.f32 %v781_v29, %v402_v60  ;;  %v444_v12 = vmax.f32 %v398_v7, 0.0 }
 0x11a   :  { %v458_v19 = vadd.f32 %v457_v15, %v427_v14  ;;  %v429_v23 = vmax.f32 %v339_v16, 0.0  ;;  %v350_v30 = vadd.f32 %v602_v17, %v781_v29  ;;  %v411_v15 = vadd.f32 %v617_v54, %v781_v29 }
 0x11b   :  { %v341_v20 = vpop.f32.mrf.mxu0  ;;  %v405_v3 = vpop.f32.mrf.mxu1  ;;  %v445_v16 = vmax.f32 %v403_v11, 0.0 }
 0x11c   :  { %v459_v24 = vadd.f32 %v458_v19, %v428_v18  ;;  %v342_v25 = vadd.f32 %v781_v29, %v341_v20  ;;  %v432_v37 = vmax.f32 %v350_v30, 0.0  ;;  %v406_v14 = vadd.f32 %v781_v29, %v405_v3 }
 0x11d   :  { %v414_v19 = vadd.f32 %v618_v2, %v781_v29  ;;  %v447_v21 = vmax.f32 %v411_v15, 0.0  ;;  %v492_v29 = vld [vmem:[#allocation8] sm:$0x1] }
 0x11e   :  { %v460_v27 = vadd.f32 %v459_v24, %v429_v23  ;;  %v430_v31 = vmax.f32 %v342_v25, 0.0  ;;  %v446_v20 = vmax.f32 %v406_v14, 0.0 }
 0x11f   :  { %v448_v23 = vmax.f32 %v414_v19, 0.0 }
 0x120   :  { %v461_v36 = vadd.f32 %v460_v27, %v430_v31 }
 0x122   :  { %v462_v38 = vadd.f32 %v461_v36, %v431_v34 }
 0x124   :  { %v463_v44 = vadd.f32 %v462_v38, %v432_v37 }
 0x126   :  { %v464_v47 = vadd.f32 %v463_v44, %v433_v43  ;;  %v503_v44 = vstv %s838_s4 }
 0x128   :  { %v465_v51 = vadd.f32 %v464_v47, %v434_v46 }
 0x12a   :  { %v466_v53 = vadd.f32 %v465_v51, %v435_v50 }
 0x12c   :  { %v467_v56 = vadd.f32 %v466_v53, %v436_v52 }
 0x12e   :  { %v468_v57 = vadd.f32 %v467_v56, %v437_v55 }
 0x130   :  { %v469_v62 = vadd.f32 %v468_v57, %v438_v58 }
 0x132   :  { %v470_v0 = vadd.f32 %v469_v62, %v439_v61 }
 0x134   :  { %v471_v49 = vadd.f32 %v470_v0, %v440_v59 }
 0x136   :  { %v472_v6 = vadd.f32 %v471_v49, %v441_v5 }
 0x138   :  { %v473_v10 = vadd.f32 %v472_v6, %v442_v8 }
 0x13a   :  { %v474_v13 = vadd.f32 %v473_v10, %v443_v9 }
 0x13c   :  { %v475_v17 = vadd.f32 %v474_v13, %v444_v12 }
 0x13e   :  { %v476_v18 = vadd.f32 %v475_v17, %v445_v16 }
 0x140   :  { %v477_v22 = vadd.f32 %v476_v18, %v446_v20 }
 0x142   :  { %v478_v24 = vadd.f32 %v477_v22, %v447_v21 }
 0x144   :  { %v479_v25 = vadd.f32 %v478_v24, %v448_v23 }
 0x146   :  { %v480_v27 = vrot.slane %v479_v25, 4 }
 0x148   :  { %v481_v30 = vadd.f32 %v480_v27, %v479_v25 }
 0x14a   :  { %v482_v31 = vrot.slane %v481_v30, 2 }
 0x14c   :  { %v483_v32 = vadd.f32 %v482_v31, %v481_v30 }
 0x14e   :  { %v484_v34 = vrot.slane %v483_v32, 1 }
 0x150   :  { %v485_v36 = vadd.f32 %v484_v34, %v483_v32 }
 0x152   :  { %v487_v37 = vmul.f32 %v486_v35, %v485_v36 }
 0x154   :  { %v489_v38 = vsel %vm488_vm1, %v487_v37, 0.0 }
 0x155   :  { %490 = vadd.xlane.f32.xlu0 %v489_v38 }
 0x1de   :  { %v491_v39 = vpop.xlane.xlu0 %490 }
 0x1df   :  { %v493_v40 = vadd.f32 %v492_v29, %v491_v39 }
 0x1e1   :  { %495 = vst.msk [vmem:[#allocation8] sm:$0x1] %vm55_vm0, %v493_v40 }
 0x1e8   :  { %v499_v42 = vld [vmem:[#allocation8] sm:$0x1] }
 0x1e9   :  { %v500_v43 = vmul.f32 0.00390625, %v499_v42 }
 0x1eb   :  { %v501_v45 = vsub.f32 0.0, %v500_v43 }
 0x1ed   :  { %v504_v46 = vsub.f32 %v501_v45, %v503_v44 }
 0x1ef   :  { %505 = vst.msk [vmem:[#allocation8] sm:$0x1] %vm55_vm0, %v504_v46 }
 0x1f0   :  { %716 = shalt.err (!%p713_p0)
}
 0x1f1   :  { %515 = dma.vmem_to_hbm [thread:$0]  %s513_s9, 16, %s839_s5, [#allocation5]  }
 0x1f2   :  { %729 = dma.done.wait [#allocation5], 16  }
 0x1f3   :  { %730 = vsyncadd [#allocation5], 4294967280 }
 0x1f4   :  { %519 = vsyncpa [#allocation4], 1 }
 0x1f5   :  { %520 = vsyncpa [#allocation7], 1 }
 0x1f6   :  { %521 = vsyncpa [#allocation5], 1 }

</bundles_post_ra>
